<compile_context>
chip_gen: v6e
topology: v6e:2x2x1
jax: 0.10.0
libtpu: 0.0.40
codegen_flags: <defaults>
</compile_context>

<pallas_src>
import functools

import jax
import jax.numpy as jnp
from jax.experimental import pallas as pl
from jax.experimental.pallas import tpu as pltpu

LANES = 128
SUBLANES = 8


def _focal_reduce_kernel(pred_ref, gt_ref, loss_ref, npos_ref, *,
                         rows, tile_rows, tiles_per_part, needs_mask):
    part = pl.program_id(0)
    i = pl.program_id(1)

    @pl.when(i == 0)
    def _():
        loss_ref[...] = jnp.zeros_like(loss_ref)
        npos_ref[...] = jnp.zeros_like(npos_ref)

    p = pred_ref[...].astype(jnp.float32)
    g = gt_ref[...].astype(jnp.float32)

    if needs_mask:
        # Neutralize rows past the logical end (ragged last tile, or a
        # duplicated tile read through the clamped index_map): pred=0.5 keeps
        # the log finite, gt=2.0 zeroes both pos and neg weights.
        row0 = (part * tiles_per_part + i) * tile_rows
        row_idx = row0 + jax.lax.broadcasted_iota(
            jnp.int32, (tile_rows, LANES), 0)
        valid = row_idx < rows
        p = jnp.where(valid, p, 0.5)
        g = jnp.where(valid, g, 2.0)

    is_pos = g == 1.0
    is_neg = g < 1.0
    pos_inds = is_pos.astype(jnp.float32)

    omp = 1.0 - p
    omg = 1.0 - g
    omg2 = omg * omg
    neg_w4 = omg2 * omg2                          # (1 - g)^4

    # Masks are mutually exclusive -> a single fused EUP log and a single
    # per-element weight.  pos_loss and neg_loss are summed together because
    # the final formula only needs their sum (pos_loss == 0 whenever the
    # num_pos == 0 branch is taken).
    logt = jnp.log(jnp.where(is_pos, p, omp))
    w_pos = omp * omp
    w_neg = p * p * neg_w4
    weight = jnp.where(is_pos, w_pos, jnp.where(is_neg, w_neg, 0.0))
    loss_elem = logt * weight

    # Fold (tile_rows, 128) -> (1, 8, 128): leading-axis sums are vreg-wise
    # VPU adds into the resident per-partition accumulators (no XLU in loop).
    loss_ref[...] += loss_elem.reshape(1, -1, SUBLANES, LANES).sum(axis=1)
    npos_ref[...] += pos_inds.reshape(1, -1, SUBLANES, LANES).sum(axis=1)


@functools.partial(jax.jit, static_argnames=("tile_rows", "num_partitions"))
def focal_loss(pred, gt, *, tile_rows=2048, num_partitions=2):
    """Pallas implementation of FocalLoss.forward(out, target).

    pred, gt: arrays of shape (B, C, H, W), pred expected in (0, 1).
    Returns a scalar float32 loss.
    """
    b = pred.shape[0]
    n = pred.size

    # Flatten to a lane-dense (rows, 128) slab, rows a multiple of 8 sublanes.
    block_elems = SUBLANES * LANES
    rows = SUBLANES * pl.cdiv(n, block_elems)
    pred_flat = pred.reshape(-1)
    gt_flat = gt.reshape(-1)
    pad = rows * LANES - n
    if pad:
        # Tail pad with neutral values (pred=0.5 keeps log finite, gt=2.0
        # zeroes both weights), so padded elements contribute exactly zero.
        pred_flat = jnp.concatenate(
            [pred_flat, jnp.full((pad,), 0.5, pred_flat.dtype)])
        gt_flat = jnp.concatenate(
            [gt_flat, jnp.full((pad,), 2.0, gt_flat.dtype)])
    pred2d = pred_flat.reshape(rows, LANES)
    gt2d = gt_flat.reshape(rows, LANES)

    # Tile sizing: multiple of 8 sublanes, never larger than the data.
    tile_rows = max(SUBLANES, (tile_rows // SUBLANES) * SUBLANES)
    tile_rows_eff = min(tile_rows, rows)
    tiles = pl.cdiv(rows, tile_rows_eff)
    num_parts = max(1, min(num_partitions, tiles))
    tiles_per_part = pl.cdiv(tiles, num_parts)
    needs_mask = (tiles * tile_rows_eff != rows) or (
        tiles_per_part * num_parts != tiles)

    kernel = functools.partial(
        _focal_reduce_kernel,
        rows=rows,
        tile_rows=tile_rows_eff,
        tiles_per_part=tiles_per_part,
        needs_mask=needs_mask,
    )

    def in_map(part, i):
        t = part * tiles_per_part + i
        # Clamp so a (possibly) out-of-range trailing tile of the last
        # partition reads an in-bounds block; the kernel masks it to zero.
        return (jnp.minimum(t, tiles - 1), 0)

    acc_shape = jax.ShapeDtypeStruct((num_parts, SUBLANES, LANES), jnp.float32)
    acc_spec = pl.BlockSpec((1, SUBLANES, LANES), lambda part, i: (part, 0, 0))

    loss_part, npos_part = pl.pallas_call(
        kernel,
        out_shape=(acc_shape, acc_shape),
        grid_spec=pltpu.PrefetchScalarGridSpec(
            num_scalar_prefetch=0,
            grid=(num_parts, tiles_per_part),
            in_specs=[
                pl.BlockSpec((tile_rows_eff, LANES), in_map),
                pl.BlockSpec((tile_rows_eff, LANES), in_map),
            ],
            out_specs=(acc_spec, acc_spec),
        ),
        compiler_params=pltpu.CompilerParams(
            dimension_semantics=("parallel", "arbitrary")),
    )(pred2d, gt2d)

    # Tiny final reductions (num_parts * 8 * 128 elements each) in plain JAX.
    total = jnp.sum(loss_part)            # pos_loss + neg_loss
    num_pos = jnp.sum(npos_part)

    # if num_pos == 0: loss = -neg_loss (pos_loss is exactly 0 there)
    # else:            loss = -(pos_loss + neg_loss) / num_pos
    safe_num_pos = jnp.where(num_pos == 0, 1.0, num_pos)
    loss = jnp.where(num_pos == 0, -total, -total / safe_num_pos)
    loss = loss / b
    # if loss > 10: loss /= 1000
    # TODO(synk): the PyTorch branch also prints diagnostics; side-effectful
    # host prints are not reproduced here.
    loss = jnp.where(loss > 10.0, loss / 1000.0, loss)
    return loss


def _reference(pred, gt):
    """Pure-JAX reference mirroring the PyTorch _neg_loss."""
    pred = pred.astype(jnp.float32)
    gt = gt.astype(jnp.float32)
    pos_inds = (gt == 1.0).astype(jnp.float32)
    neg_inds = (gt < 1.0).astype(jnp.float32)
    neg_weights = (1.0 - gt) ** 4
    pos_loss = jnp.log(pred) * (1.0 - pred) ** 2 * pos_inds
    neg_loss = jnp.log(1.0 - pred) * pred**2 * neg_weights * neg_inds
    num_pos = pos_inds.sum()
    pos_loss = pos_loss.sum()
    neg_loss = neg_loss.sum()
    loss = jnp.where(
        num_pos == 0, -neg_loss,
        -(pos_loss + neg_loss) / jnp.where(num_pos == 0, 1.0, num_pos))
    loss = loss / pred.shape[0]
    loss = jnp.where(loss > 10.0, loss / 1000.0, loss)
    return loss


if __name__ == "__main__":
    key = jax.random.PRNGKey(0)
    kp, kg = jax.random.split(key)

    B, C, H, W = 2, 4, 16, 16

    # pred strictly inside (0, 1), like a sigmoid/heatmap output.
    pred = jax.nn.sigmoid(jax.random.normal(kp, (B, C, H, W), dtype=jnp.float32))
    # gt: gaussian-like heatmap in [0, 1] with a few exact 1.0 peaks.
    gt = jax.random.uniform(kg, (B, C, H, W), dtype=jnp.float32)
    peaks = gt > 0.98
    gt = jnp.where(peaks, 1.0, gt * 0.95)

    out = focal_loss(pred, gt)
    out = jax.block_until_ready(out)

    ref = _reference(pred, gt)
    assert jnp.allclose(out, ref, rtol=1e-4, atol=1e-5), (out, ref)

    print("KERNEL_OK")
</pallas_src>

<mosaic_0001>
module attributes {stable_mosaic.version = 11 : i64} {
  func.func @_focal_reduce_kernel(%arg0: i32, %arg1: i32, %arg2: memref<16x128xf32, #tpu.memory_space<vmem>>, %arg3: memref<16x128xf32, #tpu.memory_space<vmem>>, %arg4: memref<1x8x128xf32, #tpu.memory_space<vmem>>, %arg5: memref<1x8x128xf32, #tpu.memory_space<vmem>>) attributes {dimension_semantics = [#tpu.dimension_semantics<parallel>, #tpu.dimension_semantics<arbitrary>], iteration_bounds = array<i64: 1, 1>, scalar_prefetch = 0 : i64, scratch_operands = 0 : i64, tpu.core_type = #tpu.core_type<tc>, window_params = [{transform_indices = @transform_0, window_bounds = array<i64: 16, 128>}, {transform_indices = @transform_1, window_bounds = array<i64: 16, 128>}, {transform_indices = @transform_2, window_bounds = array<i64: 1, 8, 128>}, {transform_indices = @transform_3, window_bounds = array<i64: 1, 8, 128>}]} {
    %c0_i32 = arith.constant 0 : i32
    %0 = arith.cmpi eq, %arg1, %c0_i32 : i32
    %1 = arith.extui %0 : i1 to i32
    %c0_i32_0 = arith.constant 0 : i32
    %2 = arith.cmpi ne, %1, %c0_i32_0 : i32
    scf.if %2 {
      %cst_22 = arith.constant 0.000000e+00 : f32
      %36 = vector.broadcast %cst_22 : f32 to vector<1x8x128xf32>
      %c0_23 = arith.constant 0 : index
      %c0_24 = arith.constant 0 : index
      %c0_25 = arith.constant 0 : index
      %37 = vector.load %arg4[%c0_23, %c0_24, %c0_25] : memref<1x8x128xf32, #tpu.memory_space<vmem>>, vector<1x8x128xf32>
      tpu.vector_store %arg4[%c0_23, %c0_24, %c0_25], %36 {strides = array<i32>} : memref<1x8x128xf32, #tpu.memory_space<vmem>>, vector<1x8x128xf32>,
      %cst_26 = arith.constant 0.000000e+00 : f32
      %38 = vector.broadcast %cst_26 : f32 to vector<1x8x128xf32>
      %c0_27 = arith.constant 0 : index
      %c0_28 = arith.constant 0 : index
      %c0_29 = arith.constant 0 : index
      %39 = vector.load %arg5[%c0_27, %c0_28, %c0_29] : memref<1x8x128xf32, #tpu.memory_space<vmem>>, vector<1x8x128xf32>
      tpu.vector_store %arg5[%c0_27, %c0_28, %c0_29], %38 {strides = array<i32>} : memref<1x8x128xf32, #tpu.memory_space<vmem>>, vector<1x8x128xf32>,
    } else {
    }
    %c0 = arith.constant 0 : index
    %c0_1 = arith.constant 0 : index
    %3 = vector.load %arg2[%c0, %c0_1] : memref<16x128xf32, #tpu.memory_space<vmem>>, vector<16x128xf32>
    %c0_2 = arith.constant 0 : index
    %c0_3 = arith.constant 0 : index
    %4 = vector.load %arg3[%c0_2, %c0_3] : memref<16x128xf32, #tpu.memory_space<vmem>>, vector<16x128xf32>
    %cst = arith.constant 1.000000e+00 : f32
    %5 = vector.broadcast %cst : f32 to vector<16x128xf32>
    %6 = arith.cmpf oeq, %4, %5 : vector<16x128xf32>
    %cst_4 = arith.constant 1.000000e+00 : f32
    %7 = vector.broadcast %cst_4 : f32 to vector<16x128xf32>
    %8 = arith.cmpf olt, %4, %7 : vector<16x128xf32>
    %9 = arith.extui %6 : vector<16x128xi1> to vector<16x128xi32>
    %10 = arith.sitofp %9 : vector<16x128xi32> to vector<16x128xf32>
    %cst_5 = arith.constant 1.000000e+00 : f32
    %11 = vector.broadcast %cst_5 : f32 to vector<16x128xf32>
    %12 = arith.subf %11, %3 : vector<16x128xf32>
    %cst_6 = arith.constant 1.000000e+00 : f32
    %13 = vector.broadcast %cst_6 : f32 to vector<16x128xf32>
    %14 = arith.subf %13, %4 : vector<16x128xf32>
    %15 = arith.mulf %14, %14 : vector<16x128xf32>
    %16 = arith.mulf %15, %15 : vector<16x128xf32>
    %17 = arith.select %6, %3, %12 : vector<16x128xi1>, vector<16x128xf32>
    %18 = math.log %17 : vector<16x128xf32>
    %19 = arith.mulf %12, %12 : vector<16x128xf32>
    %20 = arith.mulf %3, %3 : vector<16x128xf32>
    %21 = arith.mulf %20, %16 : vector<16x128xf32>
    %cst_7 = arith.constant 0.000000e+00 : f32
    %22 = vector.broadcast %cst_7 : f32 to vector<16x128xf32>
    %23 = arith.select %8, %21, %22 : vector<16x128xi1>, vector<16x128xf32>
    %24 = arith.select %6, %19, %23 : vector<16x128xi1>, vector<16x128xf32>
    %25 = arith.mulf %18, %24 : vector<16x128xf32>
    %c0_8 = arith.constant 0 : index
    %c0_9 = arith.constant 0 : index
    %c0_10 = arith.constant 0 : index
    %26 = vector.load %arg4[%c0_8, %c0_9, %c0_10] : memref<1x8x128xf32, #tpu.memory_space<vmem>>, vector<1x8x128xf32>
    %27 = vector.shape_cast %25 : vector<16x128xf32> to vector<1x2x8x128xf32>
    %cst_11 = arith.constant dense<0.000000e+00> : vector<1x8x128xf32>
    %28 = vector.multi_reduction <add>, %27, %cst_11 [1] : vector<1x2x8x128xf32> to vector<1x8x128xf32>
    %29 = arith.addf %26, %28 : vector<1x8x128xf32>
    %c0_12 = arith.constant 0 : index
    %c0_13 = arith.constant 0 : index
    %c0_14 = arith.constant 0 : index
    %30 = vector.load %arg4[%c0_12, %c0_13, %c0_14] : memref<1x8x128xf32, #tpu.memory_space<vmem>>, vector<1x8x128xf32>
    tpu.vector_store %arg4[%c0_12, %c0_13, %c0_14], %29 {strides = array<i32>} : memref<1x8x128xf32, #tpu.memory_space<vmem>>, vector<1x8x128xf32>,
    %c0_15 = arith.constant 0 : index
    %c0_16 = arith.constant 0 : index
    %c0_17 = arith.constant 0 : index
    %31 = vector.load %arg5[%c0_15, %c0_16, %c0_17] : memref<1x8x128xf32, #tpu.memory_space<vmem>>, vector<1x8x128xf32>
    %32 = vector.shape_cast %10 : vector<16x128xf32> to vector<1x2x8x128xf32>
    %cst_18 = arith.constant dense<0.000000e+00> : vector<1x8x128xf32>
    %33 = vector.multi_reduction <add>, %32, %cst_18 [1] : vector<1x2x8x128xf32> to vector<1x8x128xf32>
    %34 = arith.addf %31, %33 : vector<1x8x128xf32>
    %c0_19 = arith.constant 0 : index
    %c0_20 = arith.constant 0 : index
    %c0_21 = arith.constant 0 : index
    %35 = vector.load %arg5[%c0_19, %c0_20, %c0_21] : memref<1x8x128xf32, #tpu.memory_space<vmem>>, vector<1x8x128xf32>
    tpu.vector_store %arg5[%c0_19, %c0_20, %c0_21], %34 {strides = array<i32>} : memref<1x8x128xf32, #tpu.memory_space<vmem>>, vector<1x8x128xf32>,
    return
  }
  func.func @transform_0(%arg0: i32, %arg1: i32) -> (i32, i32) {
    %c1_i32 = arith.constant 1 : i32
    %0 = arith.muli %arg0, %c1_i32 : i32
    %1 = arith.addi %0, %arg1 : i32
    %c0_i32 = arith.constant 0 : i32
    %2 = arith.minsi %1, %c0_i32 : i32
    %c0_i32_0 = arith.constant 0 : i32
    %c0_i32_1 = arith.constant 0 : i32
    return %2, %c0_i32_0 : i32, i32
  }
  func.func @transform_1(%arg0: i32, %arg1: i32) -> (i32, i32) {
    %c1_i32 = arith.constant 1 : i32
    %0 = arith.muli %arg0, %c1_i32 : i32
    %1 = arith.addi %0, %arg1 : i32
    %c0_i32 = arith.constant 0 : i32
    %2 = arith.minsi %1, %c0_i32 : i32
    %c0_i32_0 = arith.constant 0 : i32
    %c0_i32_1 = arith.constant 0 : i32
    return %2, %c0_i32_0 : i32, i32
  }
  func.func @transform_2(%arg0: i32, %arg1: i32) -> (i32, i32, i32) {
    %c0_i32 = arith.constant 0 : i32
    %c0_i32_0 = arith.constant 0 : i32
    %c0_i32_1 = arith.constant 0 : i32
    return %arg0, %c0_i32, %c0_i32_0 : i32, i32, i32
  }
  func.func @transform_3(%arg0: i32, %arg1: i32) -> (i32, i32, i32) {
    %c0_i32 = arith.constant 0 : i32
    %c0_i32_0 = arith.constant 0 : i32
    %c0_i32_1 = arith.constant 0 : i32
    return %arg0, %c0_i32, %c0_i32_0 : i32, i32, i32
  }
}

</mosaic_0001>

<bundles_post_ra>
// kernel: focal_loss.1
= control target key start
LH: loop header
LB: loop body
LE: loop exit
PB: predicated region body
PF: predicated region fallthrough
CT: control target
= control target key end

     0   :  { %v156_v12 = vmov 0.0   ;;  %s201_s0 = inlined_call_operand.vmem [shape: f32[16,128], index: 0, kind: input, shape index: {}]   ;;  %s202_s1 = inlined_call_operand.vmem [shape: f32[16,128], index: 1, kind: input, shape index: {}]   ;;  %s203_s3 = inlined_call_operand.vmem [shape: f32[1,8,128], index: 3, kind: output, shape index: {1}]   ;;  %s204_s2 = inlined_call_operand.vmem [shape: f32[1,8,128], index: 2, kind: output, shape index: {0}]  }
   0x1   :  { %v83_v0 = vld [vmem:[%s201_s0] sm:$0xff]  ;;  %v84_v1 = vld [vmem:[%s201_s0 + $0x8] sm:$0xff] }
   0x2   :  { %v85_v2 = vld [vmem:[%s202_s1] sm:$0xff]  ;;  %v86_v3 = vld [vmem:[%s202_s1 + $0x8] sm:$0xff]  ;;  %v95_v4 = vsub.f32 1.0, %v83_v0  ;;  %v96_v5 = vsub.f32 1.0, %v84_v1  ;;  %v111_v16 = vmul.f32 %v83_v0, %v83_v0  ;;  %v112_v19 = vmul.f32 %v84_v1, %v84_v1 }
   0x3   :  { %vm87_vm0 = vcmp.eq.f32.partialorder %v85_v2, 1.0  ;;  %vm88_vm1 = vcmp.eq.f32.partialorder %v86_v3, 1.0  ;;  %v97_v6 = vsub.f32 1.0, %v85_v2  ;;  %v98_v7 = vsub.f32 1.0, %v86_v3 }
   0x4   :  { %v103_v8 = vsel %vm87_vm0, %v83_v0, %v95_v4  ;;  %v104_v9 = vsel %vm88_vm1, %v84_v1, %v96_v5  ;;  %v149_v13 = vsel %vm87_vm0, 1.0, %v156_v12  ;;  %v150_v14 = vsel %vm88_vm1, 1.0, %v156_v12 }
   0x5   :  { %v99_v10 = vmul.f32 %v97_v6, %v97_v6  ;;  %v100_v11 = vmul.f32 %v98_v7, %v98_v7  ;;  %152 = vlog2.f32 %v103_v8  ;;  %v126_v17 = vadd.f32 %v150_v14, %v149_v13 }
   0x6   :  { %154 = vlog2.f32 %v104_v9  ;;  %vm89_vm2 = vcmp.lt.f32.partialorder %v85_v2, 1.0  ;;  %vm90_vm3 = vcmp.lt.f32.partialorder %v86_v3, 1.0  ;;  %v109_v22 = vmul.f32 %v95_v4, %v95_v4 }
   0x7   :  { %v101_v15 = vmul.f32 %v99_v10, %v99_v10  ;;  %v102_v18 = vmul.f32 %v100_v11, %v100_v11  ;;  %128 = vst [vmem:[%s203_s3] sm:$0xff] %v126_v17  ;;  %v110_v23 = vmul.f32 %v96_v5, %v96_v5 }
   0x9   :  { %v113_v20 = vmul.f32 %v111_v16, %v101_v15  ;;  %v114_v21 = vmul.f32 %v112_v19, %v102_v18 }
   0xb   :  { %v115_v24 = vsel %vm89_vm2, %v113_v20, 0.0  ;;  %v116_v25 = vsel %vm90_vm3, %v114_v21, 0.0 }
   0xc   :  { %v117_v27 = vsel %vm87_vm0, %v109_v22, %v115_v24  ;;  %v118_v30 = vsel %vm88_vm1, %v110_v23, %v116_v25 }
  0x12   :  { %v153_v26 = vpop.eup %152 }
  0x13   :  { %v155_v28 = vpop.eup %154  ;;  %v106_v29 = vmul.f32 0.6931472, %v153_v26 }
  0x14   :  { %v108_v31 = vmul.f32 0.6931472, %v155_v28 }
  0x15   :  { %v119_v32 = vmul.f32 %v117_v27, %v106_v29 }
  0x16   :  { %v120_v33 = vmul.f32 %v118_v30, %v108_v31 }
  0x18   :  { %v122_v34 = vadd.f32 %v120_v33, %v119_v32 }
  0x1a   :  { %124 = vst [vmem:[%s204_s2] sm:$0xff] %v122_v34 }

</bundles_post_ra>
